<compile_context>
chip_gen: v7x
topology: tpu7x:2x2x1
jax: 0.10.0
libtpu: 0.0.40
codegen_flags: <defaults>
</compile_context>

<pallas_src>
import jax
import jax.numpy as jnp
from jax.experimental import pallas as pl
from jax.experimental.pallas import tpu as pltpu

_MAX_TILE_ROWS = 256   # 256 sublane-rows x 128 lanes = 32768 pixels per grid step
_SUB_ROWS = 32         # 4096-pixel compute chunks: bounds vreg live ranges and is
                       # aligned for f32/bf16/int8 sublane tilings (8/16/32)


def _round_up(x, m):
    return ((x + m - 1) // m) * m


def _cdiv(a, b):
    return (a + b - 1) // b


def _make_kernel(n_classes, ts, sub, n_steps):
    n_chunks = ts // sub

    def kernel(pred_ref, mask_ref, out_ref, acc_ref):
        # pred_ref: (1, C, ts, 128)   logits (input dtype; upcast per chunk)
        # mask_ref: (1, ts, 128)      integer class ids (any int dtype)
        # out_ref : (1, 1, 2, 128)    [ce_sum, prob_sum], sublane-reduced, written once
        # acc_ref : (2, ts, 128) f32  accumulator, resident across the pixel grid axis
        j = pl.program_id(2)

        @pl.when(j == 0)
        def _init():
            acc_ref[...] = jnp.zeros_like(acc_ref)

        def chunk(i, carry):
            r0 = pl.multiple_of(i * sub, sub)
            rows = pl.ds(r0, sub)
            lbl = mask_ref[0, rows, :].astype(jnp.int32)                 # (sub, 128)
            x = [pred_ref[0, c, rows, :].astype(jnp.float32)             # C x (sub, 128)
                 for c in range(n_classes)]

            # Per-pixel max over classes: dense VPU maximum (no cross-sublane XLU).
            m = x[0]
            for c in range(1, n_classes):
                m = jnp.maximum(m, x[c])

            # Softmax denominator + target-class logit in one unrolled pass.
            denom = jnp.exp(x[0] - m)
            tgt = jnp.where(lbl == 0, x[0], 0.0)
            for c in range(1, n_classes):
                denom = denom + jnp.exp(x[c] - m)
                tgt = jnp.where(lbl == c, x[c], tgt)

            ce = (m - tgt) + jnp.log(denom)     # per-pixel NLL of the target class
            prob = jnp.exp(-ce)                 # == softmax(pred)[target]  (dice numerator / 2)

            acc_ref[0, rows, :] += ce
            acc_ref[1, rows, :] += prob
            return carry

        jax.lax.fori_loop(0, n_chunks, chunk, 0, unroll=True)

        @pl.when(j == n_steps - 1)
        def _finish():
            out_ref[0, 0, 0:1, :] = jnp.sum(acc_ref[0], axis=0, keepdims=True)
            out_ref[0, 0, 1:2, :] = jnp.sum(acc_ref[1], axis=0, keepdims=True)

    return kernel


def _single_loss(pred, mask, n_classes, eps=1e-6):
    B, C, H, W = pred.shape
    assert C == n_classes
    hw = H * W
    n_pix = B * hw

    if not jnp.issubdtype(mask.dtype, jnp.integer):
        mask = mask.astype(jnp.int32)

    n_rows = _cdiv(hw, 128)
    ts = min(_MAX_TILE_ROWS, _round_up(n_rows, _SUB_ROWS))
    # Split the pixel axis only when the batch axis alone would leave a v7x TensorCore
    # idle (odd B) and there is enough work to amortize the extra padding.
    n_split = 2 if (B % 2 == 1 and n_rows >= 2 * ts) else 1
    n_steps = _cdiv(n_rows, ts * n_split)
    rp = n_steps * n_split * ts
    hw_pad = rp * 128

    pred3 = pred.reshape(B, C, hw)                    # contiguous reshape, no transpose
    mask3 = mask.reshape(B, hw)
    if hw_pad != hw:
        pred3 = jnp.pad(pred3, ((0, 0), (0, 0), (0, hw_pad - hw)))
        mask3 = jnp.pad(mask3, ((0, 0), (0, hw_pad - hw)))
    pred4 = pred3.reshape(B, C, rp, 128)
    mask4 = mask3.reshape(B, rp, 128)

    out = pl.pallas_call(
        _make_kernel(C, ts, _SUB_ROWS, n_steps),
        grid=(B, n_split, n_steps),
        in_specs=[
            pl.BlockSpec((1, C, ts, 128), lambda b, s, j: (b, 0, s * n_steps + j, 0)),
            pl.BlockSpec((1, ts, 128), lambda b, s, j: (b, s * n_steps + j, 0)),
        ],
        out_specs=pl.BlockSpec((1, 1, 2, 128), lambda b, s, j: (b, s, 0, 0)),
        out_shape=jax.ShapeDtypeStruct((B, n_split, 2, 128), jnp.float32),
        scratch_shapes=[pltpu.VMEM((2, ts, 128), jnp.float32)],
        compiler_params=pltpu.CompilerParams(
            dimension_semantics=("parallel", "parallel", "arbitrary")),
    )(pred4, mask4)

    ce_sum = jnp.sum(out[:, :, 0, :])
    prob_sum = jnp.sum(out[:, :, 1, :])

    # Padded pixels have all-zero logits and label 0, so each contributes exactly
    # log(C) to the CE sum and exp(-log(C)) = 1/C to the probability sum.
    n_pad = B * (hw_pad - hw)
    if n_pad:
        pad_ce = jnp.log(jnp.float32(C))
        ce_sum = ce_sum - n_pad * pad_ce
        prob_sum = prob_sum - n_pad * jnp.exp(-pad_ce)

    ce = ce_sum / n_pix
    # sum(softmax) == sum(onehot) == n_pix exactly, so sets_sum == 2*n_pix (never 0).
    dice = (2.0 * prob_sum + eps) / (2.0 * n_pix + eps)
    return 0.5 * ce + 0.5 * (1.0 - dice)


def loss_fn(pred, mask, n_classes):
    """Mirrors LossFn.forward: `pred` may be a single array or a tuple/list of arrays."""
    assert hasattr(mask, "dtype"), "The GT mask must be an array"
    if isinstance(pred, (tuple, list)):
        return sum(_single_loss(p, mask, n_classes) for p in pred) / len(pred)
    if hasattr(pred, "shape"):
        return _single_loss(pred, mask, n_classes)
    print("The output of model should be either `Array` or `Tuple/List`")
    return 0


def _ref_single_loss(pred, mask, n_classes, eps=1e-6):
    """Pure-JAX reference matching the PyTorch semantics."""
    logp = jax.nn.log_softmax(pred.astype(jnp.float32), axis=1)          # (B,C,H,W)
    onehot = jax.nn.one_hot(mask, n_classes, axis=1, dtype=jnp.float32)
    ce = -jnp.mean(jnp.sum(logp * onehot, axis=1))
    probs = jnp.exp(logp)
    inter = 2.0 * jnp.sum(probs * onehot)
    sets_sum = jnp.sum(probs) + jnp.sum(onehot)
    dice = (inter + eps) / (sets_sum + eps)
    return 0.5 * ce + 0.5 * (1.0 - dice)


if __name__ == "__main__":
    n_classes = 4
    key = jax.random.PRNGKey(0)
    k1, k2, k3, k4, k5 = jax.random.split(key, 5)

    # 1) Base case implied by the module: B=2, C=4, 16x16 (exercises padding correction).
    B, H, W = 2, 16, 16
    pred = jax.random.normal(k1, (B, n_classes, H, W), dtype=jnp.float32)
    pred2 = jax.random.normal(k2, (B, n_classes, H, W), dtype=jnp.float32)
    mask = jax.random.randint(k3, (B, H, W), 0, n_classes, dtype=jnp.int32)

    loss = jax.block_until_ready(loss_fn(pred, mask, n_classes))
    ref = _ref_single_loss(pred, mask, n_classes)
    assert abs(float(loss) - float(ref)) < 1e-3, (float(loss), float(ref))

    # 2) tuple-of-predictions path (averaged)
    loss_tup = jax.block_until_ready(loss_fn((pred, pred2), mask, n_classes))
    ref_tup = 0.5 * (_ref_single_loss(pred, mask, n_classes)
                     + _ref_single_loss(pred2, mask, n_classes))
    assert abs(float(loss_tup) - float(ref_tup)) < 1e-3, (float(loss_tup), float(ref_tup))

    # 3) bf16 logits + uint8 mask (the bandwidth-optimized input path, v5e/v6e)
    loss_lp = jax.block_until_ready(
        loss_fn(pred.astype(jnp.bfloat16), mask.astype(jnp.uint8), n_classes))
    ref_lp = _ref_single_loss(pred.astype(jnp.bfloat16), mask, n_classes)
    assert abs(float(loss_lp) - float(ref_lp)) < 2e-3, (float(loss_lp), float(ref_lp))

    # 4) B=1, 256x256: exercises the split pixel axis (n_split=2, v7x megacore)
    #    and the multi-chunk inner loop; H*W is lane-aligned (no padding).
    predL = jax.random.normal(k4, (1, n_classes, 256, 256), dtype=jnp.float32)
    maskL = jax.random.randint(k5, (1, 256, 256), 0, n_classes, dtype=jnp.int32)
    lossL = jax.block_until_ready(loss_fn(predL, maskL, n_classes))
    refL = _ref_single_loss(predL, maskL, n_classes)
    assert abs(float(lossL) - float(refL)) < 1e-3, (float(lossL), float(refL))

    print("KERNEL_OK")
</pallas_src>

<mosaic_0001>
module attributes {stable_mosaic.version = 11 : i64} {
  func.func @kernel(%arg0: i32, %arg1: i32, %arg2: i32, %arg3: memref<1x4x32x128xf32, #tpu.memory_space<vmem>>, %arg4: memref<1x32x128xi32, #tpu.memory_space<vmem>>, %arg5: memref<1x1x2x128xf32, #tpu.memory_space<vmem>>, %arg6: memref<2x32x128xf32, #tpu.memory_space<vmem>>) attributes {dimension_semantics = [#tpu.dimension_semantics<parallel>, #tpu.dimension_semantics<parallel>, #tpu.dimension_semantics<arbitrary>], iteration_bounds = array<i64: 2, 1, 1>, scalar_prefetch = 0 : i64, scratch_operands = 1 : i64, tpu.core_type = #tpu.core_type<tc>, window_params = [{transform_indices = @transform_0, window_bounds = array<i64: 1, 4, 32, 128>}, {transform_indices = @transform_1, window_bounds = array<i64: 1, 32, 128>}, {transform_indices = @transform_2, window_bounds = array<i64: 1, 1, 2, 128>}]} {
    %c0_i32 = arith.constant 0 : i32
    %0 = arith.cmpi eq, %arg2, %c0_i32 : i32
    %1 = arith.extui %0 : i1 to i32
    %c0_i32_0 = arith.constant 0 : i32
    %2 = arith.cmpi ne, %1, %c0_i32_0 : i32
    scf.if %2 {
      %cst_25 = arith.constant 0.000000e+00 : f32
      %72 = vector.broadcast %cst_25 : f32 to vector<2x32x128xf32>
      %c0_26 = arith.constant 0 : index
      %c0_27 = arith.constant 0 : index
      %c0_28 = arith.constant 0 : index
      %73 = vector.load %arg6[%c0_26, %c0_27, %c0_28] : memref<2x32x128xf32, #tpu.memory_space<vmem>>, vector<2x32x128xf32>
      tpu.vector_store %arg6[%c0_26, %c0_27, %c0_28], %72 {strides = array<i32>} : memref<2x32x128xf32, #tpu.memory_space<vmem>>, vector<2x32x128xf32>,
    } else {
    }
    %c0_i32_1 = arith.constant 0 : i32
    %c32_i32 = arith.constant 32 : i32
    %3 = arith.muli %c0_i32_1, %c32_i32 : i32
    %4 = tpu.assume_multiple %3, 32 : i32
    %c0 = arith.constant 0 : index
    %5 = arith.index_cast %4 : i32 to index
    %c0_2 = arith.constant 0 : index
    %6 = vector.load %arg4[%c0, %5, %c0_2] : memref<1x32x128xi32, #tpu.memory_space<vmem>>, vector<1x32x128xi32>
    %7 = vector.shape_cast %6 : vector<1x32x128xi32> to vector<32x128xi32>
    %c0_3 = arith.constant 0 : index
    %c0_4 = arith.constant 0 : index
    %8 = arith.index_cast %4 : i32 to index
    %c0_5 = arith.constant 0 : index
    %9 = vector.load %arg3[%c0_3, %c0_4, %8, %c0_5] : memref<1x4x32x128xf32, #tpu.memory_space<vmem>>, vector<1x1x32x128xf32>
    %10 = vector.shape_cast %9 : vector<1x1x32x128xf32> to vector<32x128xf32>
    %c0_6 = arith.constant 0 : index
    %c1 = arith.constant 1 : index
    %11 = arith.index_cast %4 : i32 to index
    %c0_7 = arith.constant 0 : index
    %12 = vector.load %arg3[%c0_6, %c1, %11, %c0_7] : memref<1x4x32x128xf32, #tpu.memory_space<vmem>>, vector<1x1x32x128xf32>
    %13 = vector.shape_cast %12 : vector<1x1x32x128xf32> to vector<32x128xf32>
    %c0_8 = arith.constant 0 : index
    %c2 = arith.constant 2 : index
    %14 = arith.index_cast %4 : i32 to index
    %c0_9 = arith.constant 0 : index
    %15 = vector.load %arg3[%c0_8, %c2, %14, %c0_9] : memref<1x4x32x128xf32, #tpu.memory_space<vmem>>, vector<1x1x32x128xf32>
    %16 = vector.shape_cast %15 : vector<1x1x32x128xf32> to vector<32x128xf32>
    %c0_10 = arith.constant 0 : index
    %c3 = arith.constant 3 : index
    %17 = arith.index_cast %4 : i32 to index
    %c0_11 = arith.constant 0 : index
    %18 = vector.load %arg3[%c0_10, %c3, %17, %c0_11] : memref<1x4x32x128xf32, #tpu.memory_space<vmem>>, vector<1x1x32x128xf32>
    %19 = vector.shape_cast %18 : vector<1x1x32x128xf32> to vector<32x128xf32>
    %20 = arith.maximumf %10, %13 : vector<32x128xf32>
    %21 = arith.maximumf %20, %16 : vector<32x128xf32>
    %22 = arith.maximumf %21, %19 : vector<32x128xf32>
    %23 = arith.subf %10, %22 : vector<32x128xf32>
    %24 = math.exp %23 : vector<32x128xf32>
    %c0_i32_12 = arith.constant 0 : i32
    %25 = vector.broadcast %c0_i32_12 : i32 to vector<32x128xi32>
    %26 = arith.cmpi eq, %7, %25 : vector<32x128xi32>
    %cst = arith.constant 0.000000e+00 : f32
    %27 = vector.broadcast %cst : f32 to vector<32x128xf32>
    %28 = arith.select %26, %10, %27 : vector<32x128xi1>, vector<32x128xf32>
    %29 = arith.subf %13, %22 : vector<32x128xf32>
    %30 = math.exp %29 : vector<32x128xf32>
    %31 = arith.addf %24, %30 : vector<32x128xf32>
    %c1_i32 = arith.constant 1 : i32
    %32 = vector.broadcast %c1_i32 : i32 to vector<32x128xi32>
    %33 = arith.cmpi eq, %7, %32 : vector<32x128xi32>
    %34 = arith.select %33, %13, %28 : vector<32x128xi1>, vector<32x128xf32>
    %35 = arith.subf %16, %22 : vector<32x128xf32>
    %36 = math.exp %35 : vector<32x128xf32>
    %37 = arith.addf %31, %36 : vector<32x128xf32>
    %c2_i32 = arith.constant 2 : i32
    %38 = vector.broadcast %c2_i32 : i32 to vector<32x128xi32>
    %39 = arith.cmpi eq, %7, %38 : vector<32x128xi32>
    %40 = arith.select %39, %16, %34 : vector<32x128xi1>, vector<32x128xf32>
    %41 = arith.subf %19, %22 : vector<32x128xf32>
    %42 = math.exp %41 : vector<32x128xf32>
    %43 = arith.addf %37, %42 : vector<32x128xf32>
    %c3_i32 = arith.constant 3 : i32
    %44 = vector.broadcast %c3_i32 : i32 to vector<32x128xi32>
    %45 = arith.cmpi eq, %7, %44 : vector<32x128xi32>
    %46 = arith.select %45, %19, %40 : vector<32x128xi1>, vector<32x128xf32>
    %47 = arith.subf %22, %46 : vector<32x128xf32>
    %48 = math.log %43 : vector<32x128xf32>
    %49 = arith.addf %47, %48 : vector<32x128xf32>
    %cst_13 = arith.constant 0.000000e+00 : f32
    %50 = vector.broadcast %cst_13 : f32 to vector<32x128xf32>
    %51 = arith.subf %50, %49 : vector<32x128xf32>
    %52 = math.exp %51 : vector<32x128xf32>
    %c0_14 = arith.constant 0 : index
    %53 = arith.index_cast %4 : i32 to index
    %c0_15 = arith.constant 0 : index
    %54 = vector.load %arg6[%c0_14, %53, %c0_15] : memref<2x32x128xf32, #tpu.memory_space<vmem>>, vector<1x32x128xf32>
    %55 = vector.shape_cast %54 : vector<1x32x128xf32> to vector<32x128xf32>
    %56 = arith.addf %55, %49 : vector<32x128xf32>
    %c0_16 = arith.constant 0 : index
    %57 = arith.index_cast %4 : i32 to index
    %c0_17 = arith.constant 0 : index
    %58 = vector.load %arg6[%c0_16, %57, %c0_17] : memref<2x32x128xf32, #tpu.memory_space<vmem>>, vector<1x32x128xf32>
    %59 = vector.shape_cast %58 : vector<1x32x128xf32> to vector<32x128xf32>
    %60 = vector.shape_cast %56 : vector<32x128xf32> to vector<1x32x128xf32>
    tpu.vector_store %arg6[%c0_16, %57, %c0_17], %60 {strides = array<i32>} : memref<2x32x128xf32, #tpu.memory_space<vmem>>, vector<1x32x128xf32>,
    %c1_18 = arith.constant 1 : index
    %61 = arith.index_cast %4 : i32 to index
    %c0_19 = arith.constant 0 : index
    %62 = vector.load %arg6[%c1_18, %61, %c0_19] : memref<2x32x128xf32, #tpu.memory_space<vmem>>, vector<1x32x128xf32>
    %63 = vector.shape_cast %62 : vector<1x32x128xf32> to vector<32x128xf32>
    %64 = arith.addf %63, %52 : vector<32x128xf32>
    %c1_20 = arith.constant 1 : index
    %65 = arith.index_cast %4 : i32 to index
    %c0_21 = arith.constant 0 : index
    %66 = vector.load %arg6[%c1_20, %65, %c0_21] : memref<2x32x128xf32, #tpu.memory_space<vmem>>, vector<1x32x128xf32>
    %67 = vector.shape_cast %66 : vector<1x32x128xf32> to vector<32x128xf32>
    %68 = vector.shape_cast %64 : vector<32x128xf32> to vector<1x32x128xf32>
    tpu.vector_store %arg6[%c1_20, %65, %c0_21], %68 {strides = array<i32>} : memref<2x32x128xf32, #tpu.memory_space<vmem>>, vector<1x32x128xf32>,
    %c1_i32_22 = arith.constant 1 : i32
    %c0_i32_23 = arith.constant 0 : i32
    %69 = arith.cmpi eq, %arg2, %c0_i32_23 : i32
    %70 = arith.extui %69 : i1 to i32
    %c0_i32_24 = arith.constant 0 : i32
    %71 = arith.cmpi ne, %70, %c0_i32_24 : i32
    scf.if %71 {
      %c0_25 = arith.constant 0 : index
      %c0_26 = arith.constant 0 : index
      %c0_27 = arith.constant 0 : index
      %72 = vector.load %arg6[%c0_25, %c0_26, %c0_27] : memref<2x32x128xf32, #tpu.memory_space<vmem>>, vector<1x32x128xf32>
      %73 = vector.shape_cast %72 : vector<1x32x128xf32> to vector<32x128xf32>
      %cst_28 = arith.constant dense<0.000000e+00> : vector<128xf32>
      %74 = vector.multi_reduction <add>, %73, %cst_28 [0] : vector<32x128xf32> to vector<128xf32>
      %75 = vector.shape_cast %74 : vector<128xf32> to vector<1x128xf32>
      %c0_29 = arith.constant 0 : index
      %c0_30 = arith.constant 0 : index
      %c0_31 = arith.constant 0 : index
      %c0_32 = arith.constant 0 : index
      %76 = vector.load %arg5[%c0_29, %c0_30, %c0_31, %c0_32] : memref<1x1x2x128xf32, #tpu.memory_space<vmem>>, vector<1x1x1x128xf32>
      %77 = vector.shape_cast %76 : vector<1x1x1x128xf32> to vector<1x128xf32>
      %78 = vector.shape_cast %75 : vector<1x128xf32> to vector<1x1x1x128xf32>
      tpu.vector_store %arg5[%c0_29, %c0_30, %c0_31, %c0_32], %78 {strides = array<i32>} : memref<1x1x2x128xf32, #tpu.memory_space<vmem>>, vector<1x1x1x128xf32>,
      %c1_33 = arith.constant 1 : index
      %c0_34 = arith.constant 0 : index
      %c0_35 = arith.constant 0 : index
      %79 = vector.load %arg6[%c1_33, %c0_34, %c0_35] : memref<2x32x128xf32, #tpu.memory_space<vmem>>, vector<1x32x128xf32>
      %80 = vector.shape_cast %79 : vector<1x32x128xf32> to vector<32x128xf32>
      %cst_36 = arith.constant dense<0.000000e+00> : vector<128xf32>
      %81 = vector.multi_reduction <add>, %80, %cst_36 [0] : vector<32x128xf32> to vector<128xf32>
      %82 = vector.shape_cast %81 : vector<128xf32> to vector<1x128xf32>
      %c0_37 = arith.constant 0 : index
      %c0_38 = arith.constant 0 : index
      %c1_39 = arith.constant 1 : index
      %c0_40 = arith.constant 0 : index
      %83 = vector.load %arg5[%c0_37, %c0_38, %c1_39, %c0_40] : memref<1x1x2x128xf32, #tpu.memory_space<vmem>>, vector<1x1x1x128xf32>
      %84 = vector.shape_cast %83 : vector<1x1x1x128xf32> to vector<1x128xf32>
      %85 = vector.shape_cast %82 : vector<1x128xf32> to vector<1x1x1x128xf32>
      tpu.vector_store %arg5[%c0_37, %c0_38, %c1_39, %c0_40], %85 {strides = array<i32>} : memref<1x1x2x128xf32, #tpu.memory_space<vmem>>, vector<1x1x1x128xf32>,
    } else {
    }
    return
  }
  func.func @transform_0(%arg0: i32, %arg1: i32, %arg2: i32) -> (i32, i32, i32, i32) {
    %c1_i32 = arith.constant 1 : i32
    %0 = arith.muli %arg1, %c1_i32 : i32
    %1 = arith.addi %0, %arg2 : i32
    %c0_i32 = arith.constant 0 : i32
    %c0_i32_0 = arith.constant 0 : i32
    %c0_i32_1 = arith.constant 0 : i32
    return %arg0, %c0_i32, %1, %c0_i32_0 : i32, i32, i32, i32
  }
  func.func @transform_1(%arg0: i32, %arg1: i32, %arg2: i32) -> (i32, i32, i32) {
    %c1_i32 = arith.constant 1 : i32
    %0 = arith.muli %arg1, %c1_i32 : i32
    %1 = arith.addi %0, %arg2 : i32
    %c0_i32 = arith.constant 0 : i32
    %c0_i32_0 = arith.constant 0 : i32
    return %arg0, %1, %c0_i32 : i32, i32, i32
  }
  func.func @transform_2(%arg0: i32, %arg1: i32, %arg2: i32) -> (i32, i32, i32, i32) {
    %c0_i32 = arith.constant 0 : i32
    %c0_i32_0 = arith.constant 0 : i32
    %c0_i32_1 = arith.constant 0 : i32
    return %arg0, %arg1, %c0_i32, %c0_i32_0 : i32, i32, i32, i32
  }
}

</mosaic_0001>

<bundles_post_ra>
// kernel: tpu_custom_call.1
= control target key start
LH: loop header
LB: loop body
LE: loop exit
PB: predicated region body
PF: predicated region fallthrough
CT: control target
= control target key end

     0   :  { %7 = vsyncpa [#allocation4], 0  ;;  %s1261_s0 = inlined_call_operand.hbm [shape: f32[2,4,32,128], index: 0, kind: input, shape index: {}]   ;;  %s1262_s1 = inlined_call_operand.hbm [shape: s32[2,32,128], index: 1, kind: input, shape index: {}]   ;;  %s1263_s2 = inlined_call_operand.hbm [shape: f32[2,1,2,128], index: 2, kind: output, shape index: {}]  }
   0x1   :  { %9 = vsyncpa [#allocation4 + $0x1], 0 }
   0x2   :  { %10 = vsyncpa [#allocation7], 0 }
   0x3   :  { %12 = vsyncpa [#allocation7 + $0x1], 0 }
   0x4   :  { %13 = vsyncpa [#allocation5], 0 }
   0x5   :  { %15 = vsyncpa [#allocation5 + $0x1], 0  ;;  %s917_s9 = smov 0   ;;  %s919_s10 = smov 0  }
   0x6   :  { %s921_s11 = smov 0   ;;  %s923_s12 = smov 0  }
   0x7   :  { %s925_s13 = smov 0   ;;  %s927_s14 = smov 0  }
   0x8 LB: > { %s600_s15 = sadd.s32 4294967295, %s895_s14   ;;  %s601_s16 = sadd.s32 4294967294, %s895_s14   ;;  %s895_s14 = sphi %s927_s14, %s21_s14   ;;  %s891_s13 = sphi %s925_s13, %s1281_s13   ;;  %s887_s12 = sphi %s923_s12, %s1280_s12   ;;  %s883_s11 = sphi %s921_s11, %s1279_s11   ;;  %s879_s10 = sphi %s919_s10, %s1278_s10   ;;  %s875_s9 = sphi %s917_s9, %s1277_s9  }
   0x9   : > { %s40_s17 = sadd.s32 1, %s891_s13  ;;  %s51_s18 = sadd.s32 1, %s883_s11 }
   0xa   : > { %p42_p0 = scmp.ge.s32.totalorder %s40_s17, 2  ;;  %p58_p1 = scmp.ne.s32.totalorder %s883_s11, %s879_s10 }
   0xb   : > { %p59_p2 = scmp.eq.s32.totalorder %s895_s14, 0  ;;  %p64_p3 = scmp.ne.s32.totalorder %s879_s10, %s875_s9 }
   0xc   : > { %s1283_s17 = smov (%p42_p0, %s40_s17), 0  ;;  %p65_p5 = scmp.eq.s32.totalorder %s600_s15, 0 }
   0xd   : > { %p958_p4 = por %p59_p2, %p58_p1  ;;  %s46_s20 = ssub.s32 %s891_s13, %s1283_s17 }
   0xe   : > { %p120_p6 = scmp.eq.s32.totalorder %s600_s15, 1  ;;  %p49_p7 = scmp.eq.s32.totalorder %s46_s20, 0 }
   0xf   : > { %p964_p8 = por %p65_p5, %p64_p3  ;;  %p126_p10 = scmp.eq.s32.totalorder %s601_s16, 1 }
  0x10   : > { %p968_p9 = por %p120_p6, %p58_p1  ;;  %p649_p13 = scmp.lt.s32.totalorder %s895_s14, 2 }
  0x11   : > { %s1267_s21 = scalar_select %p964_p8, 1, 0 }
  0x12   : > { %s1268_s22 = scalar_select %p968_p9, 1, 0 }
  0x13   : > { %s973_s23 = scalar_select %p49_p7, %s883_s11, %s51_s18  }
  0x14   : > { %p975_p11 = por %p126_p10, %p64_p3  ;;  %s982_s25 = sand.u32 1, %s883_s11  }
  0x15   : > { %s604_s26 = sshll.u32 %s982_s25, 7  ;;  %s630_s27 = sshll.u32 %s891_s13, 11 }
  0x16   : > { %s1269_s24 = scalar_select %p975_p11, 1, 0 }
  0x17   : > { %s989_s30 = scalar_lea.hbm %s1261_s0, %s630_s27  ;;  %s150_s3 = scalar_lea.vmem [#allocation3], %s604_s26 }
  0x18   : > { %s160_s4 = sshll.u32 %s150_s3, 4  ;;  %p995_p0 = pnand %p649_p13, %p958_p4  ;;  %s991_s4 = int_to_ptr.vmem [resolvable:$true] %s160_s4 }
  0x19   : > { %s147_s6 = scalar_lea.sflag [#allocation4], %s982_s25  ;;  %s749_s7 = scalar_lea.hbm %s989_s30, 2048 }
  0x1a   : > { %p750_p2 = scmp.ne.s32.totalorder %s989_s30, %s749_s7  ;;  %p751_p3 = pneg %p995_p0 }
  0x1b   : > { %s754_s16 = scalar_lea.hbm %s1261_s0, 4096  ;;  %p755_p4 = scmp.lt.u32.totalorder %s989_s30, %s1261_s0 }
  0x1c   : > { %p752_p5 = pnand %p751_p3, %p750_p2  ;;  %p756_p7 = scmp.lt.u32.totalorder %s754_s16, %s749_s7 }
  0x1d   : > { %p758_p13 = scmp.lt.u32.totalorder %s749_s7, %s989_s30 }
  0x1e   : > { %p753_p6 = pneg %p752_p5  ;;  %p757_p10 = por %p756_p7, %p755_p4 }
  0x20   : > { %p759_p12 = por %p758_p13, %p757_p10 }
  0x22   : > { %p760_p1 = pnand %p759_p12, %p753_p6 }
  0x24   : > { %763 = shalt.err (!%p760_p1)
}
  0x25   : > { %s764_s20 = scalar_lea.vmem %s991_s4, 2048  ;;  %s897_s26 = smov [#allocation3]  }
  0x26   : > { %p765_p2 = scmp.ne.s32.totalorder %s991_s4, %s764_s20  ;;  %s769_s27 = sshll.u32 %s897_s26, 4  ;;  %s770_s27 = int_to_ptr.vmem [resolvable:$false] %s769_s27 }
  0x27   : > { %s771_s28 = scalar_lea.vmem %s770_s27, 4096  ;;  %p772_p9 = scmp.lt.s32.totalorder %s991_s4, %s770_s27 }
  0x28   : > { %p767_p5 = pnand %p765_p2, %p751_p3  ;;  %p773_p4 = scmp.lt.s32.totalorder %s771_s28, %s764_s20 }
  0x2a   : > { %p768_p11 = pneg %p767_p5  ;;  %p774_p7 = por %p773_p4, %p772_p9 }
  0x2c   : > { %p775_p10 = pnand %p774_p7, %p768_p11 }
  0x2e   : > { %778 = shalt.err (!%p775_p10)
}
  0x2f   : > { %s898_s29 = smov 128   ;;  %s899_s3 = smov 8  }
  0x30   : > { %641 = dma.hbm_to_vmem [thread:$0]  (!%p995_p0), %s989_s30, 2048, %s991_s4, %s147_s6, %s898_s29, %s898_s29, %s899_s3  }
  0x31   : > { %p192_p9 = scmp.lt.s32.totalorder %s895_s14, 3  ;;  %s607_s7 = sshll.u32 %s982_s25, 5 }
  0x32   : > { %s631_s8 = sshll.u32 %s891_s13, 9  ;;  %p1271_p11 = scmp.ge.s32.totalorder %s895_s14, 1 }
  0x33   : > { %s1043_s19 = scalar_lea.hbm %s1262_s1, %s631_s8  ;;  %s174_s20 = scalar_lea.vmem [#allocation6], %s607_s7 }
  0x34   : > { %p1036_p12 = pnand %p1271_p11, %p192_p9  ;;  %s184_s26 = sshll.u32 %s174_s20, 4  ;;  %s1045_s26 = int_to_ptr.vmem [resolvable:$true] %s184_s26 }
  0x35   : > { %s171_s30 = scalar_lea.sflag [#allocation7], %s982_s25  ;;  %s779_s4 = scalar_lea.hbm %s1043_s19, 512 }
  0x36   : > { %p780_p1 = scmp.ne.s32.totalorder %s1043_s19, %s779_s4  ;;  %s784_s28 = scalar_lea.hbm %s1262_s1, 1024 }
  0x37   : > { %p785_p2 = scmp.lt.u32.totalorder %s1043_s19, %s1262_s1  ;;  %p786_p5 = scmp.lt.u32.totalorder %s784_s28, %s779_s4 }
  0x38   : > { %p782_p6 = pnand %p780_p1, %p751_p3  ;;  %p788_p7 = scmp.lt.u32.totalorder %s779_s4, %s1043_s19 }
  0x39   : > { %p787_p4 = por %p786_p5, %p785_p2 }
  0x3a   : > { %p783_p13 = pneg %p782_p6 }
  0x3b   : > { %p789_p10 = por %p788_p7, %p787_p4 }
  0x3d   : > { %p790_p9 = pnand %p789_p10, %p783_p13 }
  0x3f   : > { %793 = shalt.err (!%p790_p9)
}
  0x40   : > { %s794_s7 = scalar_lea.vmem %s1045_s26, 512  ;;  %s900_s18 = smov [#allocation6]  }
  0x41   : > { %p795_p11 = scmp.ne.s32.totalorder %s1045_s26, %s794_s7  ;;  %s799_s20 = sshll.u32 %s900_s18, 4  ;;  %s800_s20 = int_to_ptr.vmem [resolvable:$false] %s799_s20 }
  0x42   : > { %s801_s6 = scalar_lea.vmem %s800_s20, 1024  ;;  %p802_p8 = scmp.lt.s32.totalorder %s1045_s26, %s800_s20 }
  0x43   : > { %p797_p1 = pnand %p795_p11, %p751_p3  ;;  %p803_p2 = scmp.lt.s32.totalorder %s801_s6, %s794_s7 }
  0x45   : > { %p798_p6 = pneg %p797_p1  ;;  %p804_p5 = por %p803_p2, %p802_p8 }
  0x47   : > { %p805_p4 = pnand %p804_p5, %p798_p6 }
  0x49   : > { %808 = shalt.err (!%p805_p4)
}
  0x4a   : > { %644 = dma.hbm_to_vmem [thread:$0]  (!%p995_p0), %s1043_s19, 512, %s1045_s26, %s171_s30, %s898_s29, %s898_s29, %s899_s3  }
  0x4b   : > { %196 = sbr.rel (%p1036_p12) target bundleno = 186 (0xba), region = 28  ;;  %s1079_s4 = sand.u32 (!%p1036_p12), 1, %s879_s10  }
  0x4c   : > { %s611_s27 = sshll.u32 (!%p1036_p12), %s1079_s4, 7  ;;  %s199_s28 = scalar_lea.sflag (!%p1036_p12), [#allocation4], %s1079_s4 }
  0x4d   : > { %s202_s5 = scalar_lea.vmem (!%p1036_p12), [#allocation3], %s611_s27  ;;  %p1273_p8 = scmp.ne.s32.totalorder (!%p1036_p12), %s1267_s21, 0 }
  0x52   : > { %862 = dma.done.wait (%p1273_p8), %s199_s28, 2048  }
  0x53   : > { %864 = vsyncadd (%p1273_p8), %s199_s28, 4294965248  ;;  %s612_s25 = sshll.u32 %s1079_s4, 5  ;;  %s208_s29 = scalar_lea.sflag [#allocation7], %s1079_s4 }
  0x54   : > { %s1089_s3 = scalar_lea.vmem [#allocation6], %s612_s25 }
  0x55   : > { %866 = dma.done.wait (%p1273_p8), %s208_s29, 512  }
  0x56   : > { %868 = vsyncadd (%p1273_p8), %s208_s29, 4294966784  ;;  %v1095_v0 = vld [vmem:[%s202_s5] sm:$0xff]  ;;  %v1097_v1 = vld [vmem:[%s202_s5 + $0x8] sm:$0xff]  ;;  %s613_s21 = sshll.u32 %s1079_s4, 1  ;;  %s627_s26 = sshll.u32 %s887_s12, 5 }
  0x57   : > { %v1099_v2 = vld [vmem:[%s202_s5 + $0x10] sm:$0xff]  ;;  %v1101_v3 = vld [vmem:[%s202_s5 + $0x18] sm:$0xff]  ;;  %v1103_v4 = vld [vmem:[%s202_s5 + $0x20] sm:$0xff]  ;;  %s236_s15 = scalar_lea.vmem [#allocation8], %s613_s21  ;;  %s1214_s16 = scalar_lea.hbm %s1263_s2, %s627_s26 }
  0x58   : > { %v1105_v5 = vld [vmem:[%s202_s5 + $0x28] sm:$0xff]  ;;  %v1107_v6 = vld [vmem:[%s202_s5 + $0x30] sm:$0xff]  ;;  %v1109_v7 = vld [vmem:[%s202_s5 + $0x38] sm:$0xff]  ;;  %v279_v8 = vmax.f32 %v1095_v0, %v1103_v4  ;;  %s483_s19 = sshll.u32 %s236_s15, 4  ;;  %s469_s7 = scalar_lea.sflag [#allocation5], %s1079_s4  ;;  %s1209_s19 = int_to_ptr.vmem [resolvable:$true] %s483_s19 }
  0x59   : > { %v1113_v9 = vld [vmem:[%s202_s5 + $0x40] sm:$0xff]  ;;  %v1115_v10 = vld [vmem:[%s202_s5 + $0x48] sm:$0xff]  ;;  %v1117_v11 = vld [vmem:[%s202_s5 + $0x50] sm:$0xff]  ;;  %v280_v12 = vmax.f32 %v1097_v1, %v1105_v5  ;;  %v281_v13 = vmax.f32 %v1099_v2, %v1107_v6  ;;  %v282_v14 = vmax.f32 %v1101_v3, %v1109_v7  ;;  %s809_s18 = scalar_lea.vmem %s1209_s19, 32  ;;  %p1274_p3 = scmp.ne.s32.totalorder %s1268_s22, 0 }
  0x5a   : > { %v1125_v15 = vld [vmem:[%s202_s5 + $0x58] sm:$0xff]  ;;  %v1127_v16 = vld [vmem:[%s202_s5 + $0x60] sm:$0xff]  ;;  %v1129_v17 = vld [vmem:[%s202_s5 + $0x68] sm:$0xff]  ;;  %v283_v18 = vmax.f32 %v279_v8, %v1113_v9  ;;  %p810_p0 = scmp.ne.s32.totalorder %s1209_s19, %s809_s18  ;;  %s901_s12 = smov [#allocation8]  }
  0x5b   : > { %v1132_v19 = vld [vmem:[%s202_s5 + $0x70] sm:$0xff]  ;;  %v1134_v20 = vld [vmem:[%s202_s5 + $0x78] sm:$0xff]  ;;  %v284_v21 = vmax.f32 %v280_v12, %v1115_v10  ;;  %v285_v22 = vmax.f32 %v281_v13, %v1117_v11  ;;  %v286_v23 = vmax.f32 %v282_v14, %v1125_v15  ;;  %s813_s20 = sshll.u32 %s901_s12, 4  ;;  %s814_s20 = int_to_ptr.vmem [resolvable:$false] %s813_s20 }
  0x5c   : > { %v1140_v24 = vmax.f32 %v283_v18, %v1127_v16  ;;  %v253_v18 = vld [vmem:[%s1089_s3] sm:$0xff]  ;;  %p811_p12 = pnand %p810_p0, %p1274_p3  ;;  %s815_s6 = scalar_lea.vmem %s814_s20, 64 }
  0x5d   : > { %v1143_v25 = vmax.f32 %v284_v21, %v1129_v17  ;;  %v1146_v26 = vmax.f32 %v285_v22, %v1132_v19  ;;  %v1149_v27 = vmax.f32 %v286_v23, %v1134_v20  ;;  %v254_v23 = vld [vmem:[%s1089_s3 + $0x8] sm:$0xff]  ;;  %vm303_vm0 = vcmp.eq.s32.totalorder %v253_v18, 0  ;;  %p816_p7 = scmp.lt.s32.totalorder %s1209_s19, %s814_s20  ;;  %p817_p10 = scmp.lt.s32.totalorder %s815_s6, %s809_s18 }
  0x5e   : > { %v291_v28 = vsub.f32 %v1095_v0, %v1140_v24  ;;  %v311_v29 = vsub.f32 %v1103_v4, %v1140_v24  ;;  %v335_v41 = vsub.f32 %v1113_v9, %v1140_v24  ;;  %v359_v49 = vsub.f32 %v1127_v16, %v1140_v24  ;;  %p812_p13 = pneg %p811_p12 }
  0x5f   : > { %v292_v30 = vsub.f32 %v1097_v1, %v1143_v25  ;;  %v293_v31 = vsub.f32 %v1099_v2, %v1146_v26  ;;  %v294_v32 = vsub.f32 %v1101_v3, %v1149_v27  ;;  %v312_v33 = vsub.f32 %v1105_v5, %v1143_v25  ;;  %p818_p9 = por %p817_p10, %p816_p7 }
  0x60   : > { %v295_v34 = vmul.f32 1.442695, %v291_v28  ;;  %v313_v35 = vsub.f32 %v1107_v6, %v1146_v26  ;;  %v314_v39 = vsub.f32 %v1109_v7, %v1149_v27  ;;  %v315_v40 = vmul.f32 1.442695, %v311_v29  ;;  %v255_v28 = vld [vmem:[%s1089_s3 + $0x10] sm:$0xff] }
  0x61   : > { %v297_v36 = vmul.f32 1.442695, %v292_v30  ;;  %v299_v37 = vmul.f32 1.442695, %v293_v31  ;;  %v301_v38 = vmul.f32 1.442695, %v294_v32  ;;  %v336_v43 = vsub.f32 %v1115_v10, %v1143_v25  ;;  %p819_p11 = pnand %p818_p9, %p812_p13 }
  0x62   : > { %701 = vpow2.f32 %v295_v34  ;;  %v317_v42 = vmul.f32 1.442695, %v312_v33  ;;  %v319_v44 = vmul.f32 1.442695, %v313_v35  ;;  %v337_v45 = vsub.f32 %v1117_v11, %v1146_v26  ;;  %v256_v31 = vld [vmem:[%s1089_s3 + $0x18] sm:$0xff] }
  0x63   : > { %703 = vpow2.f32 %v297_v36  ;;  %v321_v46 = vmul.f32 1.442695, %v314_v39  ;;  %v338_v47 = vsub.f32 %v1125_v15, %v1149_v27  ;;  %v339_v48 = vmul.f32 1.442695, %v335_v41 }
  0x64   : > { %705 = vpow2.f32 %v299_v37  ;;  %v341_v50 = vmul.f32 1.442695, %v336_v43  ;;  %v360_v51 = vsub.f32 %v1129_v17, %v1143_v25  ;;  %v343_v52 = vmul.f32 1.442695, %v337_v45 }
  0x65   : > { %707 = vpow2.f32 %v301_v38  ;;  %v361_v53 = vsub.f32 %v1132_v19, %v1146_v26  ;;  %v345_v54 = vmul.f32 1.442695, %v338_v47  ;;  %v362_v55 = vsub.f32 %v1134_v20, %v1149_v27 }
  0x66   : > { %709 = vpow2.f32 %v315_v40  ;;  %v363_v56 = vmul.f32 1.442695, %v359_v49  ;;  %v365_v57 = vmul.f32 1.442695, %v360_v51  ;;  %vm304_vm1 = vcmp.eq.s32.totalorder %v254_v23, 0 }
  0x67   : > { %711 = vpow2.f32 %v317_v42  ;;  %v367_v59 = vmul.f32 1.442695, %v361_v53  ;;  %v369_v61 = vmul.f32 1.442695, %v362_v55  ;;  %vm305_vm2 = vcmp.eq.s32.totalorder %v255_v28, 0 }
  0x68   : > { %713 = vpow2.f32 %v319_v44  ;;  %vm306_vm3 = vcmp.eq.s32.totalorder %v256_v31, 0  ;;  %v307_v40 = vsel %vm303_vm0, %v1095_v0, 0.0  ;;  %vm327_vm4 = vcmp.eq.s32.totalorder %v253_v18, 1 }
  0x69   : > { %715 = vpow2.f32 %v321_v46  ;;  %v308_v43 = vsel %vm304_vm1, %v1097_v1, 0.0  ;;  %v309_v44 = vsel %vm305_vm2, %v1099_v2, 0.0  ;;  %vm328_vm5 = vcmp.eq.s32.totalorder %v254_v23, 1 }
  0x6a   : > { %717 = vpow2.f32 %v339_v48  ;;  %v310_v47 = vsel %vm306_vm3, %v1101_v3, 0.0  ;;  %vm329_vm6 = vcmp.eq.s32.totalorder %v255_v28, 1  ;;  %vm330_vm7 = vcmp.eq.s32.totalorder %v256_v31, 1 }
  0x6b   : > { %719 = vpow2.f32 %v341_v50  ;;  %v331_v50 = vsel %vm327_vm4, %v1103_v4, %v307_v40  ;;  %vm351_vm8 = vcmp.eq.s32.totalorder %v253_v18, 2  ;;  %v332_v51 = vsel %vm328_vm5, %v1105_v5, %v308_v43 }
  0x6c   : > { %v702_v58 = vpop.eup %701  ;;  %721 = vpow2.f32 %v343_v52  ;;  %vm352_vm9 = vcmp.eq.s32.totalorder %v254_v23, 2  ;;  %v333_v2 = vsel %vm329_vm6, %v1107_v6, %v309_v44  ;;  %v334_v52 = vsel %vm330_vm7, %v1109_v7, %v310_v47 }
  0x6d   : > { %v704_v60 = vpop.eup %703  ;;  %723 = vpow2.f32 %v345_v54  ;;  %vm353_vm10 = vcmp.eq.s32.totalorder %v255_v28, 2  ;;  %vm354_vm11 = vcmp.eq.s32.totalorder %v256_v31, 2  ;;  %v355_v3 = vsel %vm351_vm8, %v1113_v9, %v331_v50 }
  0x6e   : > { %v706_v62 = vpop.eup %705  ;;  %725 = vpow2.f32 %v363_v56  ;;  %vm375_vm12 = vcmp.eq.s32.totalorder %v253_v18, 3  ;;  %v356_v4 = vsel %vm352_vm9, %v1115_v10, %v332_v51  ;;  %vm376_vm13 = vcmp.eq.s32.totalorder %v254_v23, 3 }
  0x6f   : > { %v708_v63 = vpop.eup %707  ;;  %727 = vpow2.f32 %v365_v57  ;;  %v357_v53 = vsel %vm353_vm10, %v1117_v11, %v333_v2  ;;  %vm377_vm14 = vcmp.eq.s32.totalorder %v255_v28, 3  ;;  %v358_v5 = vsel %vm354_vm11, %v1125_v15, %v334_v52 }
  0x70   : > { %v710_v8 = vpop.eup %709  ;;  %729 = vpow2.f32 %v367_v59  ;;  %vm378_vm15 = vcmp.eq.s32.totalorder %v256_v31, 3  ;;  %v379_v6 = vsel %vm375_vm12, %v1127_v16, %v355_v3  ;;  %v380_v7 = vsel %vm376_vm13, %v1129_v17, %v356_v4 }
  0x71   : > { %v712_v12 = vpop.eup %711  ;;  %v323_v13 = vadd.f32 %v710_v8, %v702_v58  ;;  %731 = vpow2.f32 %v369_v61  ;;  %v381_v54 = vsel %vm377_vm14, %v1132_v19, %v357_v53  ;;  %v382_v55 = vsel %vm378_vm15, %v1134_v20, %v358_v5 }
  0x72   : > { %v714_v14 = vpop.eup %713  ;;  %v324_v21 = vadd.f32 %v712_v12, %v704_v60  ;;  %v383_v9 = vsub.f32 %v1140_v24, %v379_v6  ;;  %v384_v10 = vsub.f32 %v1143_v25, %v380_v7  ;;  %v385_v11 = vsub.f32 %v1146_v26, %v381_v54 }
  0x73   : > { %v716_v22 = vpop.eup %715  ;;  %v325_v29 = vadd.f32 %v714_v14, %v706_v62  ;;  %v386_v15 = vsub.f32 %v1149_v27, %v382_v55 }
  0x74   : > { %v718_v30 = vpop.eup %717  ;;  %v326_v32 = vadd.f32 %v716_v22, %v708_v63 }
  0x75   : > { %v720_v33 = vpop.eup %719  ;;  %v347_v34 = vadd.f32 %v718_v30, %v323_v13 }
  0x76   : > { %v722_v35 = vpop.eup %721  ;;  %v348_v36 = vadd.f32 %v720_v33, %v324_v21 }
  0x77   : > { %v724_v37 = vpop.eup %723  ;;  %v349_v38 = vadd.f32 %v722_v35, %v325_v29 }
  0x78   : > { %v726_v39 = vpop.eup %725  ;;  %v350_v41 = vadd.f32 %v724_v37, %v326_v32 }
  0x79   : > { %v728_v42 = vpop.eup %727  ;;  %v371_v45 = vadd.f32 %v726_v39, %v347_v34 }
  0x7a   : > { %v730_v46 = vpop.eup %729  ;;  %v372_v48 = vadd.f32 %v728_v42, %v348_v36 }
  0x7b   : > { %v732_v49 = vpop.eup %731  ;;  %v373_v0 = vadd.f32 %v730_v46, %v349_v38  ;;  %733 = vlog2.f32 %v371_v45 }
  0x7c   : > { %v374_v1 = vadd.f32 %v732_v49, %v350_v41  ;;  %735 = vlog2.f32 %v372_v48 }
  0x7d   : > { %737 = vlog2.f32 %v373_v0 }
  0x7e   : > { %739 = vlog2.f32 %v374_v1 }
  0x85   : > { %v734_v56 = vpop.eup %733 }
  0x86   : > { %v736_v57 = vpop.eup %735  ;;  %v388_v58 = vmul.f32 0.6931472, %v734_v56 }
  0x87   : > { %v738_v59 = vpop.eup %737  ;;  %v390_v60 = vmul.f32 0.6931472, %v736_v57 }
  0x88   : > { %v740_v16 = vpop.eup %739  ;;  %v392_v61 = vmul.f32 0.6931472, %v738_v59  ;;  %v395_v17 = vadd.f32 %v388_v58, %v383_v9 }
  0x89   : > { %v394_v62 = vmul.f32 0.6931472, %v740_v16  ;;  %v396_v19 = vadd.f32 %v390_v60, %v384_v10 }
  0x8a   : > { %v397_v63 = vadd.f32 %v392_v61, %v385_v11  ;;  %v399_v20 = vsub.f32 0.0, %v395_v17 }
  0x8b   : > { %v398_v8 = vadd.f32 %v394_v62, %v386_v15  ;;  %v400_v24 = vsub.f32 0.0, %v396_v19  ;;  %v443_v12 = vadd.f32 %v396_v19, %v395_v17 }
  0x8c   : > { %v401_v25 = vsub.f32 0.0, %v397_v63  ;;  %v403_v13 = vmul.f32 1.442695, %v399_v20 }
  0x8d   : > { %v402_v14 = vsub.f32 0.0, %v398_v8  ;;  %v405_v26 = vmul.f32 1.442695, %v400_v24  ;;  %v444_v18 = vadd.f32 %v443_v12, %v397_v63 }
  0x8e   : > { %741 = vpow2.f32 %v403_v13  ;;  %v407_v21 = vmul.f32 1.442695, %v401_v25 }
  0x8f   : > { %743 = vpow2.f32 %v405_v26  ;;  %v409_v27 = vmul.f32 1.442695, %v402_v14  ;;  %v445_v22 = vadd.f32 %v444_v18, %v398_v8 }
  0x90   : > { %745 = vpow2.f32 %v407_v21 }
  0x91   : > { %747 = vpow2.f32 %v409_v27  ;;  %v446_v23 = vrot.slane %v445_v22, 4 }
  0x93   : > { %v447_v28 = vadd.f32 %v446_v23, %v445_v22 }
  0x95   : > { %v448_v29 = vrot.slane %v447_v28, 2 }
  0x97   : > { %v449_v30 = vadd.f32 %v448_v29, %v447_v28 }
  0x98   : > { %v742_v31 = vpop.eup %741 }
  0x99   : > { %v744_v32 = vpop.eup %743  ;;  %v450_v33 = vrot.slane %v449_v30, 1 }
  0x9a   : > { %v746_v34 = vpop.eup %745  ;;  %v458_v35 = vadd.f32 %v744_v32, %v742_v31 }
  0x9b   : > { %v748_v36 = vpop.eup %747  ;;  %v451_v37 = vadd.f32 %v450_v33, %v449_v30 }
  0x9c   : > { %v459_v38 = vadd.f32 %v746_v34, %v458_v35 }
  0x9d   : > { %452 = vst [vmem:[%s236_s15] sm:$0x1] %v451_v37 }
  0x9e   : > { %v460_v39 = vadd.f32 %v748_v36, %v459_v38 }
  0xa0   : > { %v461_v40 = vrot.slane %v460_v39, 4 }
  0xa2   : > { %v462_v41 = vadd.f32 %v461_v40, %v460_v39 }
  0xa4   : > { %v463_v42 = vrot.slane %v462_v41, 2 }
  0xa6   : > { %v464_v43 = vadd.f32 %v463_v42, %v462_v41 }
  0xa8   : > { %v465_v44 = vrot.slane %v464_v43, 1 }
  0xaa   : > { %v466_v45 = vadd.f32 %v465_v44, %v464_v43 }
  0xac   : > { %467 = vst [vmem:[%s236_s15 + $0x1] sm:$0x1] %v466_v45 }
  0xad   : > { %822 = shalt.err (!%p819_p11)
}
  0xae   : > { %s823_s4 = scalar_lea.hbm %s1214_s16, 32  ;;  %s827_s5 = scalar_lea.hbm %s1263_s2, 64 }
  0xaf   : > { %p824_p1 = scmp.ne.s32.totalorder %s1214_s16, %s823_s4  ;;  %p828_p5 = scmp.lt.u32.totalorder %s1214_s16, %s1263_s2 }
  0xb0   : > { %p829_p4 = scmp.lt.u32.totalorder %s827_s5, %s823_s4  ;;  %p831_p0 = scmp.lt.u32.totalorder %s823_s4, %s1214_s16 }
  0xb1   : > { %p825_p6 = pnand %p824_p1, %p1274_p3 }
  0xb2   : > { %p830_p8 = por %p829_p4, %p828_p5 }
  0xb3   : > { %p826_p2 = pneg %p825_p6 }
  0xb4   : > { %p832_p12 = por %p831_p0, %p830_p8 }
  0xb6   : > { %p833_p13 = pnand %p832_p12, %p826_p2 }
  0xb8   : > { %836 = shalt.err (!%p833_p13)
}
  0xb9   : > { %636 = dma.vmem_to_hbm [thread:$0]  (%p1274_p3), %s1209_s19, 32, %s1214_s16, %s469_s7  }
  0xba PF: > { %s495_s3 = sand.u32 1, %s875_s9   ;;  %p1275_p7 = scmp.ne.s32.totalorder %s1269_s24, 0 }
  0xbb   : > { %p1276_p10 = scmp.ge.s32.totalorder %s895_s14, 2  ;;  %s496_s21 = scalar_lea.sflag [#allocation5], %s495_s3 }
  0xbd   : > { %p646_p9 = pnand %p1276_p10, %p1275_p7 }
  0xbf   : > { %870 = dma.done.wait (!%p646_p9), %s496_s21, 32  }
  0xc0   : > { %872 = vsyncadd (!%p646_p9), %s496_s21, 4294967264  ;;  %s21_s14 = sadd.s32 1, %s895_s14   ;;  %s1277_s9 = smov %s879_s10 }
  0xc1   : > { %p18_p11 = scmp.ge.s32.totalorder %s21_s14, 4   ;;  %s1278_s10 = smov %s883_s11 }
  0xc2   : > { %s1279_s11 = smov %s973_s23  ;;  %s1280_s12 = smov %s891_s13 }
  0xc3   : > { %s1281_s13 = smov %s1283_s17  ;;  %20 = sbr.rel (!%p18_p11) target bundleno = 8 (0x8), region = 99 }
  0xca   :  { %501 = vsyncpa [#allocation4], 1 }
  0xcb   :  { %503 = vsyncpa [#allocation4 + $0x1], 1 }
  0xcc   :  { %504 = vsyncpa [#allocation7], 1 }
  0xcd   :  { %506 = vsyncpa [#allocation7 + $0x1], 1 }
  0xce   :  { %507 = vsyncpa [#allocation5], 1 }
  0xcf   :  { %509 = vsyncpa [#allocation5 + $0x1], 1 }

</bundles_post_ra>
